<compile_context>
chip_gen: v7x
topology: tpu7x:2x2x1
jax: 0.10.0
libtpu: 0.0.40
codegen_flags: <defaults>
</compile_context>

<pallas_src>
import functools

import jax
import jax.numpy as jnp
import numpy as np
from jax.experimental import pallas as pl
from jax.experimental.pallas import tpu as pltpu


def _rup(x, m):
    return (x + m - 1) // m * m


# ---------------------------------------------------------------------------
# Kernel
# ---------------------------------------------------------------------------
def _critic_kernel(s_ref, a_ref, w_ref, q_ref, *, sp, ap, cw):
    # Static slices of the packed weight slab (all sublane offsets are x8).
    w0 = w_ref[0:sp, :]                                   # (sp, cw) embed W (+ bias row)
    w1e = w_ref[sp:sp + cw, :]                            # (cw, cw) layer-1 W, embedding slice
    w1a = w_ref[sp + cw:sp + cw + ap, :]                  # (ap, cw) layer-1 W, action slice (+ bias / ones col)
    w2 = w_ref[sp + cw + ap:sp + cw + ap + 8, :][0:1, :].astype(jnp.float32)  # (1, cw)

    s = s_ref[...]                                        # (TB, sp) bf16: [state | 1 | 0...]
    a = a_ref[...]                                        # (TB, ap) bf16: [action | 1 | 0...]

    # e = ReLU(state @ We + be)     (bias folded via the ones column of s)
    e = jnp.maximum(jnp.dot(s, w0, preferred_element_type=jnp.float32), 0.0)

    # h = ReLU(cat(e, action) @ W1^T + b1)  ==  ReLU(e @ W1e + a @ W1a)  (b1 folded)
    # column `n_features` of h is a constant 1 (ones-passthrough from the action side).
    h = jnp.maximum(
        jnp.dot(e.astype(jnp.bfloat16), w1e, preferred_element_type=jnp.float32)
        + jnp.dot(a, w1a, preferred_element_type=jnp.float32),
        0.0)

    # q = h @ W2^T + b2   (b2 folded via the constant-1 lane of h); n_output == 1
    q_ref[...] = jnp.sum(h * w2, axis=-1, keepdims=True)


# ---------------------------------------------------------------------------
# Wrapper
# ---------------------------------------------------------------------------
def critic_forward(state, action, slab, dims, *, batch_tile=128):
    state_dim, action_dim, n_embed, n_features, n_output = dims
    assert n_output == 1, "fused final reduce assumes a single Q output"

    sp = _rup(state_dim + 1, 8)
    ap = _rup(action_dim + 1, 8)
    cw = _rup(max(n_embed, n_features + 1), 8)

    B = state.shape[0]
    tb = min(batch_tile, _rup(B, 8))
    bp = _rup(B, tb)

    # Pad batch + append the bias "ones" columns; cast MXU operands to bf16.
    s_pad = jnp.zeros((bp, sp), jnp.bfloat16)
    s_pad = s_pad.at[:B, :state_dim].set(state.astype(jnp.bfloat16))
    s_pad = s_pad.at[:B, state_dim].set(1.0)
    a_pad = jnp.zeros((bp, ap), jnp.bfloat16)
    a_pad = a_pad.at[:B, :action_dim].set(action.astype(jnp.bfloat16))
    a_pad = a_pad.at[:B, action_dim].set(1.0)

    flops = 2 * bp * (sp * cw + cw * cw + ap * cw) + 2 * bp * cw
    bytes_accessed = (s_pad.size + a_pad.size + slab.size) * 2 + bp * 4

    kernel = functools.partial(_critic_kernel, sp=sp, ap=ap, cw=cw)

    q = pl.pallas_call(
        kernel,
        out_shape=jax.ShapeDtypeStruct((bp, 1), jnp.float32),
        grid=(bp // tb,),
        in_specs=[
            pl.BlockSpec((tb, sp), lambda i: (i, 0)),
            pl.BlockSpec((tb, ap), lambda i: (i, 0)),
            pl.BlockSpec(slab.shape, lambda i: (0, 0)),   # weights: fetched once, VMEM-resident
        ],
        out_specs=pl.BlockSpec((tb, 1), lambda i: (i, 0)),
        compiler_params=pltpu.CompilerParams(
            dimension_semantics=("parallel",),            # 2x on v7x megacore; no-op on v5e/v6e
            vmem_limit_bytes=32 * 1024 * 1024),           # safe on v7x's 64 MiB physical VMEM
        cost_estimate=pl.CostEstimate(flops=int(flops),
                                      transcendentals=0,
                                      bytes_accessed=int(bytes_accessed)),
    )(s_pad, a_pad, slab)

    # torch.squeeze(q): drop all size-1 dims (glue, outside the kernel)
    return jnp.squeeze(q[:B])


# ---------------------------------------------------------------------------
# Parameters (xavier init matching the PyTorch reference) + slab packing
# ---------------------------------------------------------------------------
def _xavier_uniform(key, fan_out, fan_in, gain):
    limit = gain * np.sqrt(6.0 / (fan_in + fan_out))
    return jax.random.uniform(key, (fan_out, fan_in), jnp.float32, -limit, limit)


def _linear_bias(key, fan_in, n_out):
    bound = 1.0 / np.sqrt(fan_in)
    return jax.random.uniform(key, (n_out,), jnp.float32, -bound, bound)


def init_raw_params(key, state_dim, action_dim, n_embed, n_features, n_output):
    k = jax.random.split(key, 6)
    relu_gain = np.sqrt(2.0)  # nn.init.calculate_gain('relu')
    # TODO(synk): kwargs['embedding'] is an arbitrary shared module in the original
    # example; implemented here as the Linear(state->n_embed)+ReLU it uses.
    we = _xavier_uniform(k[0], n_embed, state_dim, relu_gain)           # (n_embed, state_dim)
    be = _linear_bias(k[1], state_dim, n_embed)                         # (n_embed,)
    w1 = _xavier_uniform(k[2], n_features, n_embed + action_dim, relu_gain)
    b1 = _linear_bias(k[3], n_embed + action_dim, n_features)
    w2 = _xavier_uniform(k[4], n_output, n_features, 1.0)               # linear gain
    b2 = _linear_bias(k[5], n_features, n_output)
    return we, be, w1, b1, w2, b2


def pack_params(raw, state_dim, action_dim, n_embed, n_features, n_output):
    """Pack all weights/biases into one bf16 slab of shape (sp+cw+ap+8, cw)."""
    we, be, w1, b1, w2, b2 = raw
    sp = _rup(state_dim + 1, 8)
    ap = _rup(action_dim + 1, 8)
    cw = _rup(max(n_embed, n_features + 1), 8)

    slab = jnp.zeros((sp + cw + ap + 8, cw), jnp.float32)
    # W0 block: embedding weight (transposed to (in, out)) + bias row at index state_dim.
    slab = slab.at[:state_dim, :n_embed].set(we.T)
    slab = slab.at[state_dim, :n_embed].set(be)
    # W1e block: layer-1 weight slice acting on the embedding features.
    slab = slab.at[sp:sp + n_embed, :n_features].set(w1[:, :n_embed].T)
    # W1a block: layer-1 weight slice acting on the action, bias row, ones-passthrough col.
    o = sp + cw
    slab = slab.at[o:o + action_dim, :n_features].set(w1[:, n_embed:].T)
    slab = slab.at[o + action_dim, :n_features].set(b1)
    slab = slab.at[o + action_dim, n_features].set(1.0)
    # W2 block: final weight row, with b2 stored in the ones-passthrough lane.
    o2 = sp + cw + ap
    slab = slab.at[o2, :n_features].set(w2[0])
    slab = slab.at[o2, n_features].set(b2[0])
    return slab.astype(jnp.bfloat16)


def critic_reference(state, action, raw):
    """Pure-JAX f32 reference matching the PyTorch forward."""
    we, be, w1, b1, w2, b2 = raw
    e = jax.nn.relu(state @ we.T + be)
    x = jnp.concatenate([e, action], axis=1)
    h = jax.nn.relu(x @ w1.T + b1)
    q = h @ w2.T + b2
    return jnp.squeeze(q)


if __name__ == "__main__":
    B = 8            # batch
    state_dim = 24   # walker-stand observation dim
    action_dim = 6   # walker action dim
    n_embed = 32     # embedding network output features
    n_features = 32  # critic hidden features
    n_output = 1     # Q-value

    key = jax.random.PRNGKey(0)
    k_state, k_action, k_params = jax.random.split(key, 3)

    state = jax.random.normal(k_state, (B, state_dim), jnp.float32)
    action = jax.random.uniform(k_action, (B, action_dim), jnp.float32, -1.0, 1.0)

    raw = init_raw_params(k_params, state_dim, action_dim, n_embed, n_features, n_output)
    slab = pack_params(raw, state_dim, action_dim, n_embed, n_features, n_output)

    dims = (state_dim, action_dim, n_embed, n_features, n_output)
    q = critic_forward(state, action, slab, dims)
    q = jax.block_until_ready(q)

    assert q.shape == (B,), q.shape
    q_ref = critic_reference(state, action, raw)
    np.testing.assert_allclose(np.asarray(q), np.asarray(q_ref), rtol=0.08, atol=0.15)
    print("KERNEL_OK")
</pallas_src>

<mosaic_0001>
module attributes {stable_mosaic.version = 11 : i64} {
  func.func @_critic_kernel(%arg0: i32, %arg1: memref<8x32xbf16, #tpu.memory_space<vmem>>, %arg2: memref<8x8xbf16, #tpu.memory_space<vmem>>, %arg3: memref<88x40xbf16, #tpu.memory_space<vmem>>, %arg4: memref<8x1xf32, #tpu.memory_space<vmem>>) attributes {dimension_semantics = [#tpu.dimension_semantics<parallel>], iteration_bounds = array<i64: 1>, scalar_prefetch = 0 : i64, scratch_operands = 0 : i64, tpu.core_type = #tpu.core_type<tc>, window_params = [{transform_indices = @transform_0, window_bounds = array<i64: 8, 32>}, {transform_indices = @transform_1, window_bounds = array<i64: 8, 8>}, {pipeline_mode = #tpu.pipeline_mode<synchronous>, transform_indices = @transform_2, window_bounds = array<i64: 88, 40>}, {transform_indices = @transform_3, window_bounds = array<i64: 8, 1>}]} {
    %c0 = arith.constant 0 : index
    %c0_0 = arith.constant 0 : index
    %0 = vector.load %arg3[%c0, %c0_0] : memref<88x40xbf16, #tpu.memory_space<vmem>>, vector<32x40xbf16>
    %c32 = arith.constant 32 : index
    %c0_1 = arith.constant 0 : index
    %1 = vector.load %arg3[%c32, %c0_1] : memref<88x40xbf16, #tpu.memory_space<vmem>>, vector<40x40xbf16>
    %c72 = arith.constant 72 : index
    %c0_2 = arith.constant 0 : index
    %2 = vector.load %arg3[%c72, %c0_2] : memref<88x40xbf16, #tpu.memory_space<vmem>>, vector<8x40xbf16>
    %c80 = arith.constant 80 : index
    %c0_3 = arith.constant 0 : index
    %3 = vector.load %arg3[%c80, %c0_3] : memref<88x40xbf16, #tpu.memory_space<vmem>>, vector<8x40xbf16>
    %4 = vector.extract_strided_slice %3 {offsets = [0, 0], sizes = [1, 40], strides = [1, 1]} : vector<8x40xbf16> to vector<1x40xbf16>
    %5 = arith.extf %4 : vector<1x40xbf16> to vector<1x40xf32>
    %c0_4 = arith.constant 0 : index
    %c0_5 = arith.constant 0 : index
    %6 = vector.load %arg1[%c0_4, %c0_5] : memref<8x32xbf16, #tpu.memory_space<vmem>>, vector<8x32xbf16>
    %c0_6 = arith.constant 0 : index
    %c0_7 = arith.constant 0 : index
    %7 = vector.load %arg2[%c0_6, %c0_7] : memref<8x8xbf16, #tpu.memory_space<vmem>>, vector<8x8xbf16>
    %cst = arith.constant dense<0.000000e+00> : vector<8x40xf32>
    %8 = tpu.matmul %6, %0, %cst {dimension_numbers = #tpu.dot_dimension_numbers<[1], [0], [0], [1], [0, 0, 1, 1], [], []>} : vector<8x32xbf16>, vector<32x40xbf16>, vector<8x40xf32> -> vector<8x40xf32>
    %cst_8 = arith.constant 0.000000e+00 : f32
    %9 = vector.broadcast %cst_8 : f32 to vector<8x40xf32>
    %10 = arith.maximumf %8, %9 : vector<8x40xf32>
    %11 = arith.truncf %10 : vector<8x40xf32> to vector<8x40xbf16>
    %cst_9 = arith.constant dense<0.000000e+00> : vector<8x40xf32>
    %12 = tpu.matmul %11, %1, %cst_9 {dimension_numbers = #tpu.dot_dimension_numbers<[1], [0], [0], [1], [0, 0, 1, 1], [], []>} : vector<8x40xbf16>, vector<40x40xbf16>, vector<8x40xf32> -> vector<8x40xf32>
    %cst_10 = arith.constant dense<0.000000e+00> : vector<8x40xf32>
    %13 = tpu.matmul %7, %2, %cst_10 {dimension_numbers = #tpu.dot_dimension_numbers<[1], [0], [0], [1], [0, 0, 1, 1], [], []>} : vector<8x8xbf16>, vector<8x40xbf16>, vector<8x40xf32> -> vector<8x40xf32>
    %14 = arith.addf %12, %13 : vector<8x40xf32>
    %cst_11 = arith.constant 0.000000e+00 : f32
    %15 = vector.broadcast %cst_11 : f32 to vector<8x40xf32>
    %16 = arith.maximumf %14, %15 : vector<8x40xf32>
    %17 = vector.broadcast %5 : vector<1x40xf32> to vector<8x40xf32>
    %18 = arith.mulf %16, %17 : vector<8x40xf32>
    %cst_12 = arith.constant dense<0.000000e+00> : vector<8xf32>
    %19 = vector.multi_reduction <add>, %18, %cst_12 [1] : vector<8x40xf32> to vector<8xf32>
    %20 = vector.shape_cast %19 : vector<8xf32> to vector<8x1xf32>
    %c0_13 = arith.constant 0 : index
    %c0_14 = arith.constant 0 : index
    %21 = vector.load %arg4[%c0_13, %c0_14] : memref<8x1xf32, #tpu.memory_space<vmem>>, vector<8x1xf32>
    tpu.vector_store %arg4[%c0_13, %c0_14], %20 {strides = array<i32>} : memref<8x1xf32, #tpu.memory_space<vmem>>, vector<8x1xf32>,
    return
  }
  func.func @transform_0(%arg0: i32) -> (i32, i32) {
    %c0_i32 = arith.constant 0 : i32
    %c0_i32_0 = arith.constant 0 : i32
    return %arg0, %c0_i32 : i32, i32
  }
  func.func @transform_1(%arg0: i32) -> (i32, i32) {
    %c0_i32 = arith.constant 0 : i32
    %c0_i32_0 = arith.constant 0 : i32
    return %arg0, %c0_i32 : i32, i32
  }
  func.func @transform_2(%arg0: i32) -> (i32, i32) {
    %c0_i32 = arith.constant 0 : i32
    %c0_i32_0 = arith.constant 0 : i32
    %c0_i32_1 = arith.constant 0 : i32
    return %c0_i32, %c0_i32_0 : i32, i32
  }
  func.func @transform_3(%arg0: i32) -> (i32, i32) {
    %c0_i32 = arith.constant 0 : i32
    %c0_i32_0 = arith.constant 0 : i32
    return %arg0, %c0_i32 : i32, i32
  }
}

</mosaic_0001>

<bundles_post_ra>
// kernel: tpu_custom_call.1
= control target key start
LH: loop header
LB: loop body
LE: loop exit
PB: predicated region body
PF: predicated region fallthrough
CT: control target
= control target key end

     0   :  { %v264_v0 = vmov 0.0   ;;  %vm265_vm0 = vmmov 0   ;;  %vm91_vm1 = vcmask 1043456   ;;  %vm87_vm2 = vcmask 64512   ;;  %s323_s2 = inlined_call_operand.vmem [shape: bf16[88,40], index: 2, kind: input, shape index: {}]   ;;  %s324_s1 = inlined_call_operand.vmem [shape: bf16[8,8], index: 1, kind: input, shape index: {}]   ;;  %s325_s0 = inlined_call_operand.vmem [shape: bf16[8,32], index: 0, kind: input, shape index: {}]   ;;  %s326_s3 = inlined_call_operand.vmem [shape: f32[8,1], index: 3, kind: output, shape index: {}]  }
   0x1   :  { %229 = vmatprep.subr.bf16.mxu0 %v264_v0  ;;  %v259_v1 = vld [vmem:[%s323_s2] sm:$0xff]   ;;  %233 = vmatprep.mubr.msk.bf16.mxu0 %vm265_vm0, %v264_v0  ;;  %v260_v2 = vld [vmem:[%s323_s2 + $0x8] sm:$0xff]   ;;  %v262_v6 = vld [vmem:[%s323_s2 + $0x10] sm:$0xff]   ;;  %vm41_vm3 = vcmask 261120   ;;  %vm150_vm4 = vcmask 326656   ;;  %v198_v17 = vlaneseq  ;;  %vm206_vm5 = vcmask 7168  }
   0x2   :  { %237 = vmatprep.subr.bf16.mxu1 %v264_v0  ;;  %239 = vmatprep.mubr.msk.bf16.mxu1 %vm265_vm0, %v264_v0  ;;  %v24_v3 = vld [vmem:[%s323_s2 + $0x24] sm:$0xf]  ;;  %v28_v5 = vld [vmem:[%s324_s1] sm:$0xf]  ;;  %v263_v8 = vld [vmem:[%s323_s2 + $0x18] sm:$0xff]  }
   0x3   :  { %230 = vmatpush3.bf16.msra.mxu0 %v259_v1  ;;  %v93_v4 = vsel %vm91_vm1, %v24_v3, 0  ;;  %v27_v7 = vld [vmem:[%s325_s0] sm:$0xf]  ;;  %v199_v18 = vshrl.u32 %v198_v17, 7  ;;  %v25_v19 = vld [vmem:[%s323_s2 + $0x28] sm:$0xf] }
   0x4   :  { %231 = vmatprep.subr.bf16.mxu0 %v264_v0  ;;  %238 = vmatpush3.bf16.msra.mxu1 %v93_v4  ;;  %v261_v9 = vld [vmem:[%s323_s2 + $0x20] ss:$0 sps:$4 sm:$0xff]   ;;  %v26_v20 = vunpack.c.l.bf16 %v25_v19 }
   0x5   :  { %243 = vmatprep.subr.bf16.mxu1 %v264_v0  ;;  %v155_v10 = vsel %vm91_vm1, %v261_v9, 0  ;;  %v200_v21 = vsub.s32 0, %v199_v18 }
   0x7   :  { %232 = vmatpush3.bf16.msra.mxu0 %v260_v2  ;;  %240 = vmatmul.mubr.msk.bf16.vlgmr.msra.gmra.mrb[0].mxu1 %vm87_vm2, %v28_v5  ;;  %v201_v22 = vrot.slane %v26_v20, %v200_v21 }
   0x8   :  { %244 = vmatpush3.bf16.msra.mxu1 %v262_v6  ;;  %249 = vmatprep.mubr.msk.bf16.mxu1 %vm265_vm0, %v264_v0 }
   0x9   :  { %245 = vmatprep.subr.bf16.mxu1 %v264_v0 }
   0xa   :  { %234 = vmatmul.mubr.msk.bf16.vlgmr.msra.gmra.mrb[0].mxu0 %vm41_vm3, %v27_v7 }
   0xc   :  { %246 = vmatpush3.bf16.msra.mxu1 %v263_v8 }
   0xd   :  { %247 = vmatprep.subr.bf16.mxu1 %v264_v0 }
  0x10   :  { %248 = vmatpush3.bf16.msra.mxu1 %v155_v10 }
  0xdd   :  { %v79_v11 = vpop.f32.mrb[0].mxu0 }
  0xde   :  { %v85_v12 = vmax.f32 %v79_v11, 0.0  ;;  %v235_v13 = vpop.f32.mrb[1].mxu0 }
  0xdf   :  { %v82_v14 = vpop.f32.mrb[2].mxu0 }
  0xe0   :  { %v86_v15 = vpack.c.bf16 %v85_v12, %v85_v12  ;;  %v236_v16 = vpop.f32.mrb[3].mxu0 }
  0xe2   :  { %250 = vmatmul.mubr.msk.bf16.vlgmr.msra.gmra.mrb[0].mxu1 %vm150_vm4, %v86_v15 }
 0x1b5   :  { %v191_v23 = vpop.f32.mrb[0].mxu1 }
 0x1b6   :  { %v197_v24 = vmax.f32 %v191_v23, 0.0  ;;  %v251_v25 = vpop.f32.mrb[1].mxu1 }
 0x1b7   :  { %v194_v26 = vpop.f32.mrb[2].mxu1 }
 0x1b8   :  { %v252_v27 = vpop.f32.mrb[3].mxu1  ;;  %v202_v28 = vmul.f32 %v201_v22, %v197_v24 }
 0x1ba   :  { %v203_v29 = vsel %vm150_vm4, %v202_v28, 0.0 }
 0x1bb   :  { %204 = vadd.xlane.f32.xlu0 %v203_v29 }
 0x248   :  { %v205_v30 = vpop.xlane.xlu0 %204 }
 0x249   :  { %207 = vst.msk [vmem:[%s326_s3] sm:$0xff] %vm206_vm5, %v205_v30 }

</bundles_post_ra>
